<compile_context>
chip_gen: v7x
topology: tpu7x:2x2x1
jax: 0.10.0
libtpu: 0.0.40
codegen_flags: <defaults>
</compile_context>

<pallas_src>
import functools
import math

import jax
import jax.numpy as jnp
from jax.experimental import pallas as pl
from jax.experimental.pallas import tpu as pltpu


def _round_up(n, m):
    return ((n + m - 1) // m) * m


def _cdiv(a, b):
    return -(-a // b)


def _choose_batch_tiling(batch, batch_tile):
    """Pick (TB, Bp): TB multiple of 8, small padding waste, >=2 steps when big."""
    b8 = _round_up(batch, 8)
    if b8 <= batch_tile:
        # Small batch fits one tile; split in two once it's large enough to be
        # worth sharding across v7x's 2 TensorCores (no effect on v5e/v6e).
        n_tiles = 2 if b8 >= 512 else 1
    else:
        n_tiles = max(2, _cdiv(b8, batch_tile))
    tb = _round_up(_cdiv(b8, n_tiles), 8)
    bp = _round_up(b8, tb)
    return tb, bp


def _two_layer_kernel(x_ref, w1_ref, b1_ref, w2_ref, b2_ref, out_ref):
    # In-kernel bf16 cast of the activations (free VPU work hidden under DMA).
    x = x_ref[...].astype(jnp.bfloat16)
    # fc1: [TB, D](bf16) @ [D, Hp](bf16) -> f32 accumulate on the MXU.
    h = jnp.dot(x, w1_ref[...], preferred_element_type=jnp.float32)
    # Bias add + sigmoid in f32 (VPU + EUP path; v5e has no bf16 VPU/EUP).
    h = jax.nn.sigmoid(h + b1_ref[...])
    # fc2: explicit bf16 cast for the MXU, f32 accumulate, bias add, final cast.
    out = jnp.dot(h.astype(jnp.bfloat16), w2_ref[...],
                  preferred_element_type=jnp.float32)
    out_ref[...] = (out + b2_ref[...]).astype(out_ref.dtype)


def pack_params(w1, b1, w2, b2):
    """One-time packing: zero-pad H/C to multiples of 128, cast weights to bf16.

    Zero padding keeps the math exact: padded hidden units have zero fc1
    weights/bias (sigmoid(0)=0.5) but zero fc2 rows, so they contribute nothing;
    padded classes are sliced off by the caller.
    """
    D, H = w1.shape
    C = w2.shape[1]
    Hp = _round_up(H, 128)
    Cp = _round_up(C, 128)
    bf16, f32 = jnp.bfloat16, jnp.float32
    w1_p = jnp.zeros((D, Hp), bf16).at[:, :H].set(w1.astype(bf16))
    b1_p = jnp.zeros((1, Hp), f32).at[:, :H].set(b1.astype(f32).reshape(1, H))
    w2_p = jnp.zeros((Hp, Cp), bf16).at[:H, :C].set(w2.astype(bf16))
    b2_p = jnp.zeros((1, Cp), f32).at[:, :C].set(b2.astype(f32).reshape(1, C))
    return w1_p, b1_p, w2_p, b2_p


@functools.partial(jax.jit,
                   static_argnames=("num_classes", "out_dtype", "batch_tile"))
def two_layer_net(x, w1_p, b1_p, w2_p, b2_p, *, num_classes,
                  out_dtype=jnp.float32, batch_tile=1024):
    """Fused forward pass. x: [B, ...] (flattened inside), returns [B, num_classes]."""
    B = x.shape[0]
    x2d = x.reshape(B, -1)                          # == torch x.view(B, -1)
    D = x2d.shape[1]
    assert w1_p.shape[0] == D, (w1_p.shape, D)
    Hp = w1_p.shape[1]
    Cp = w2_p.shape[1]

    TB, Bp = _choose_batch_tiling(B, batch_tile)
    n_steps = Bp // TB

    # Only pad the batch axis (native dtype); no feature-dim pad, no host cast.
    x_p = x2d if Bp == B else jnp.zeros((Bp, D), x2d.dtype).at[:B].set(x2d)

    # Scoped-VMEM budget: double-buffered x / out tiles + resident weights +
    # f32 intermediates, with 25% slack; clamp to [32 MiB, 64 MiB] so we stay
    # above v5e's 16 MiB default and inside v7x's 64 MiB physical VMEM.
    x_bytes = jnp.dtype(x2d.dtype).itemsize
    o_bytes = jnp.dtype(out_dtype).itemsize
    vmem_est = (2 * TB * D * x_bytes            # x tile (double-buffered)
                + 2 * TB * Cp * o_bytes         # out tile (double-buffered)
                + 2 * (D * Hp * 2 + Hp * Cp * 2 + Hp * 4 + Cp * 4)  # weights
                + TB * Hp * 4 + TB * Cp * 4)    # f32 h / acc intermediates
    vmem_limit = int(min(64 << 20, max(32 << 20, (vmem_est * 5) // 4)))

    out = pl.pallas_call(
        _two_layer_kernel,
        out_shape=jax.ShapeDtypeStruct((Bp, Cp), out_dtype),
        grid_spec=pltpu.PrefetchScalarGridSpec(
            num_scalar_prefetch=0,
            grid=(n_steps,),
            in_specs=[
                pl.BlockSpec((TB, D), lambda i: (i, 0)),    # x: batch-tiled, full D
                pl.BlockSpec((D, Hp), lambda i: (0, 0)),    # w1: VMEM-resident
                pl.BlockSpec((1, Hp), lambda i: (0, 0)),    # b1: VMEM-resident
                pl.BlockSpec((Hp, Cp), lambda i: (0, 0)),   # w2: VMEM-resident
                pl.BlockSpec((1, Cp), lambda i: (0, 0)),    # b2: VMEM-resident
            ],
            out_specs=pl.BlockSpec((TB, Cp), lambda i: (i, 0)),
        ),
        compiler_params=pltpu.CompilerParams(
            dimension_semantics=("parallel",),
            vmem_limit_bytes=vmem_limit),
    )(x_p, w1_p, b1_p, w2_p, b2_p)

    return out[:B, :num_classes]


def init_params(key, input_dim, hidden_size, num_classes, dtype=jnp.float32):
    """Deterministic init mimicking nn.Linear's U(-1/sqrt(fan_in), 1/sqrt(fan_in))."""
    k1, k2, k3, k4 = jax.random.split(key, 4)
    bound1 = 1.0 / math.sqrt(input_dim)
    bound2 = 1.0 / math.sqrt(hidden_size)
    # Stored transposed relative to torch ([in, out] instead of [out, in]).
    w1 = jax.random.uniform(k1, (input_dim, hidden_size), dtype, -bound1, bound1)
    b1 = jax.random.uniform(k2, (hidden_size,), dtype, -bound1, bound1)
    w2 = jax.random.uniform(k3, (hidden_size, num_classes), dtype, -bound2, bound2)
    b2 = jax.random.uniform(k4, (num_classes,), dtype, -bound2, bound2)
    return w1, b1, w2, b2


if __name__ == "__main__":
    key = jax.random.PRNGKey(0)
    kx, kp = jax.random.split(key)

    # Small shapes consistent with the module: NCHW image input flattened.
    B, C_in, Hs, Ws = 2, 4, 16, 16
    input_dim = C_in * Hs * Ws          # 1024
    hidden_size = 32
    num_classes = 10

    x = jax.random.normal(kx, (B, C_in, Hs, Ws), dtype=jnp.float32)
    w1, b1, w2, b2 = init_params(kp, input_dim, hidden_size, num_classes)

    # One-time parameter packing (pad to lane-dense 128 multiples, cast to bf16).
    packed = pack_params(w1, b1, w2, b2)

    out = two_layer_net(x, *packed, num_classes=num_classes)
    jax.block_until_ready(out)

    # Cross-check against plain JAX f32 reference (loose tol: MXU inputs are bf16).
    x2d = x.reshape(B, -1)
    ref = jax.nn.sigmoid(x2d @ w1 + b1) @ w2 + b2
    assert out.shape == (B, num_classes)
    assert out.dtype == ref.dtype
    assert jnp.allclose(out, ref, atol=3e-2, rtol=3e-2), (
        f"max abs err {jnp.max(jnp.abs(out - ref))}")

    print("KERNEL_OK")
</pallas_src>

<mosaic_0001>
module attributes {stable_mosaic.version = 11 : i64} {
  func.func @_two_layer_kernel(%arg0: i32, %arg1: memref<8x1024xf32, #tpu.memory_space<vmem>>, %arg2: memref<1024x128xbf16, #tpu.memory_space<vmem>>, %arg3: memref<1x128xf32, #tpu.memory_space<vmem>>, %arg4: memref<128x128xbf16, #tpu.memory_space<vmem>>, %arg5: memref<1x128xf32, #tpu.memory_space<vmem>>, %arg6: memref<8x128xf32, #tpu.memory_space<vmem>>) attributes {dimension_semantics = [#tpu.dimension_semantics<parallel>], iteration_bounds = array<i64: 1>, scalar_prefetch = 0 : i64, scratch_operands = 0 : i64, tpu.core_type = #tpu.core_type<tc>, window_params = [{transform_indices = @transform_0, window_bounds = array<i64: 8, 1024>}, {pipeline_mode = #tpu.pipeline_mode<synchronous>, transform_indices = @transform_1, window_bounds = array<i64: 1024, 128>}, {pipeline_mode = #tpu.pipeline_mode<synchronous>, transform_indices = @transform_2, window_bounds = array<i64: 1, 128>}, {pipeline_mode = #tpu.pipeline_mode<synchronous>, transform_indices = @transform_3, window_bounds = array<i64: 128, 128>}, {pipeline_mode = #tpu.pipeline_mode<synchronous>, transform_indices = @transform_4, window_bounds = array<i64: 1, 128>}, {transform_indices = @transform_5, window_bounds = array<i64: 8, 128>}]} {
    %c0 = arith.constant 0 : index
    %c0_0 = arith.constant 0 : index
    %0 = vector.load %arg1[%c0, %c0_0] : memref<8x1024xf32, #tpu.memory_space<vmem>>, vector<8x1024xf32>
    %1 = arith.truncf %0 : vector<8x1024xf32> to vector<8x1024xbf16>
    %c0_1 = arith.constant 0 : index
    %c0_2 = arith.constant 0 : index
    %2 = vector.load %arg2[%c0_1, %c0_2] : memref<1024x128xbf16, #tpu.memory_space<vmem>>, vector<1024x128xbf16>
    %cst = arith.constant dense<0.000000e+00> : vector<8x128xf32>
    %3 = tpu.matmul %1, %2, %cst {dimension_numbers = #tpu.dot_dimension_numbers<[1], [0], [0], [1], [0, 0, 1, 1], [], []>} : vector<8x1024xbf16>, vector<1024x128xbf16>, vector<8x128xf32> -> vector<8x128xf32>
    %c0_3 = arith.constant 0 : index
    %c0_4 = arith.constant 0 : index
    %4 = vector.load %arg3[%c0_3, %c0_4] : memref<1x128xf32, #tpu.memory_space<vmem>>, vector<1x128xf32>
    %5 = vector.broadcast %4 : vector<1x128xf32> to vector<8x128xf32>
    %6 = arith.addf %3, %5 : vector<8x128xf32>
    %7 = arith.negf %6 : vector<8x128xf32>
    %8 = math.exp %7 : vector<8x128xf32>
    %cst_5 = arith.constant 1.000000e+00 : f32
    %9 = vector.broadcast %cst_5 : f32 to vector<8x128xf32>
    %10 = arith.addf %9, %8 : vector<8x128xf32>
    %11 = arith.divf %9, %10 : vector<8x128xf32>
    %12 = arith.truncf %11 : vector<8x128xf32> to vector<8x128xbf16>
    %c0_6 = arith.constant 0 : index
    %c0_7 = arith.constant 0 : index
    %13 = vector.load %arg4[%c0_6, %c0_7] : memref<128x128xbf16, #tpu.memory_space<vmem>>, vector<128x128xbf16>
    %cst_8 = arith.constant dense<0.000000e+00> : vector<8x128xf32>
    %14 = tpu.matmul %12, %13, %cst_8 {dimension_numbers = #tpu.dot_dimension_numbers<[1], [0], [0], [1], [0, 0, 1, 1], [], []>} : vector<8x128xbf16>, vector<128x128xbf16>, vector<8x128xf32> -> vector<8x128xf32>
    %c0_9 = arith.constant 0 : index
    %c0_10 = arith.constant 0 : index
    %15 = vector.load %arg5[%c0_9, %c0_10] : memref<1x128xf32, #tpu.memory_space<vmem>>, vector<1x128xf32>
    %16 = vector.broadcast %15 : vector<1x128xf32> to vector<8x128xf32>
    %17 = arith.addf %14, %16 : vector<8x128xf32>
    %c0_11 = arith.constant 0 : index
    %c0_12 = arith.constant 0 : index
    %18 = vector.load %arg6[%c0_11, %c0_12] : memref<8x128xf32, #tpu.memory_space<vmem>>, vector<8x128xf32>
    tpu.vector_store %arg6[%c0_11, %c0_12], %17 {strides = array<i32>} : memref<8x128xf32, #tpu.memory_space<vmem>>, vector<8x128xf32>,
    return
  }
  func.func @transform_0(%arg0: i32) -> (i32, i32) {
    %c0_i32 = arith.constant 0 : i32
    %c0_i32_0 = arith.constant 0 : i32
    return %arg0, %c0_i32 : i32, i32
  }
  func.func @transform_1(%arg0: i32) -> (i32, i32) {
    %c0_i32 = arith.constant 0 : i32
    %c0_i32_0 = arith.constant 0 : i32
    %c0_i32_1 = arith.constant 0 : i32
    return %c0_i32, %c0_i32_0 : i32, i32
  }
  func.func @transform_2(%arg0: i32) -> (i32, i32) {
    %c0_i32 = arith.constant 0 : i32
    %c0_i32_0 = arith.constant 0 : i32
    %c0_i32_1 = arith.constant 0 : i32
    return %c0_i32, %c0_i32_0 : i32, i32
  }
  func.func @transform_3(%arg0: i32) -> (i32, i32) {
    %c0_i32 = arith.constant 0 : i32
    %c0_i32_0 = arith.constant 0 : i32
    %c0_i32_1 = arith.constant 0 : i32
    return %c0_i32, %c0_i32_0 : i32, i32
  }
  func.func @transform_4(%arg0: i32) -> (i32, i32) {
    %c0_i32 = arith.constant 0 : i32
    %c0_i32_0 = arith.constant 0 : i32
    %c0_i32_1 = arith.constant 0 : i32
    return %c0_i32, %c0_i32_0 : i32, i32
  }
  func.func @transform_5(%arg0: i32) -> (i32, i32) {
    %c0_i32 = arith.constant 0 : i32
    %c0_i32_0 = arith.constant 0 : i32
    return %arg0, %c0_i32 : i32, i32
  }
}

</mosaic_0001>

<bundles_post_ra>
// kernel: two_layer_net.1
= control target key start
LH: loop header
LB: loop body
LE: loop exit
PB: predicated region body
PF: predicated region fallthrough
CT: control target
= control target key end

     0   :  { %10 = vsyncpa [#allocation3], 0  ;;  %s1151_s18 = smov [#allocation2]   ;;  %s1255_s0 = inlined_call_operand.vmem [shape: f32[8,1024], index: 0, kind: input, shape index: {}]   ;;  %s1256_s1 = inlined_call_operand.hbm [shape: bf16[1024,128], index: 1, kind: input, shape index: {}]   ;;  %s1257_s2 = inlined_call_operand.vmem [shape: f32[1,128], index: 2, kind: input, shape index: {}]   ;;  %s1258_s3 = inlined_call_operand.vmem [shape: bf16[128,128], index: 3, kind: input, shape index: {}]   ;;  %s1259_s4 = inlined_call_operand.vmem [shape: f32[1,128], index: 4, kind: input, shape index: {}]   ;;  %s1260_s5 = inlined_call_operand.vmem [shape: f32[8,128], index: 5, kind: output, shape index: {}]  }
   0x1   :  { %s18_s19 = sshll.u32 %s1151_s18, 4  ;;  %s1127_s22 = scalar_lea.hbm %s1256_s1, 8192  ;;  %s19_s19 = int_to_ptr.vmem [resolvable:$true] %s18_s19 }
   0x2   :  { %p1128_p0 = scmp.ne.s32.totalorder %s1256_s1, %s1127_s22  ;;  %p1131_p1 = scmp.lt.u32.totalorder %s1127_s22, %s1256_s1 }
   0x4   :  { %p1133_p2 = pnand %p1131_p1, %p1128_p0 }
   0x6   :  { %1136 = shalt.err (!%p1133_p2)
}
   0x7   :  { %s1137_s27 = scalar_lea.vmem %s19_s19, 8192  ;;  %p1142_p4 = scmp.lt.s32.totalorder %s19_s19, %s19_s19 }
   0x8   :  { %p1138_p3 = scmp.ne.s32.totalorder %s19_s19, %s1137_s27  ;;  %p1143_p5 = scmp.lt.s32.totalorder %s1137_s27, %s1137_s27 }
   0xa   :  { %p1144_p6 = por %p1143_p5, %p1142_p4 }
   0xc   :  { %p1145_p7 = pnand %p1144_p6, %p1138_p3 }
   0xe   :  { %1148 = shalt.err (!%p1145_p7)
}
   0xf   :  { %s1152_s28 = smov 64   ;;  %s1153_s29 = smov 4  }
  0x10   :  { %24 = dma.hbm_to_vmem [thread:$0]  %s1256_s1, 8192, %s19_s19, [#allocation3], %s1152_s28, %s1152_s28, %s1153_s29  }
  0x11   :  { %1149 = dma.done.wait [#allocation3], 8192  }
  0x12   :  { %1150 = vsyncadd [#allocation3], 4294959104  ;;  %v1051_v0 = vld [vmem:[#allocation2 + $0x40] sm:$0xff]   ;;  %v1055_v4 = vld [vmem:[#allocation2 + $0x48] sm:$0xff]   ;;  %vm1155_vm0 = vmmov 0  }
  0x13   :  { %v1052_v1 = vld [vmem:[#allocation2 + $0xc0] sm:$0xff]   ;;  %929 = vmatprep.subr.bf16.mxu0 %v1051_v0  ;;  %v1056_v5 = vld [vmem:[#allocation2 + $0xc8] sm:$0xff]   ;;  %v1059_v8 = vld [vmem:[#allocation2 + $0x50] sm:$0xff]  }
  0x14   :  { %v1053_v2 = vld [vmem:[#allocation2] sm:$0xff]   ;;  %951 = vmatprep.subr.bf16.mxu1 %v1052_v1  ;;  %v1057_v6 = vld [vmem:[#allocation2 + $0x8] sm:$0xff]   ;;  %v1060_v9 = vld [vmem:[#allocation2 + $0xd0] sm:$0xff]  }
  0x15   :  { %v1054_v3 = vld [vmem:[#allocation2 + $0x80] sm:$0xff]   ;;  %930 = vmatpush3.bf16.msra.mxu0 %v1053_v2  ;;  %v1058_v7 = vld [vmem:[#allocation2 + $0x88] sm:$0xff]   ;;  %v1061_v10 = vld [vmem:[#allocation2 + $0x10] sm:$0xff]  }
  0x16   :  { %952 = vmatpush3.bf16.msra.mxu1 %v1054_v3  ;;  %931 = vmatprep.subr.bf16.mxu0 %v1055_v4  ;;  %v1062_v11 = vld [vmem:[#allocation2 + $0x90] sm:$0xff]   ;;  %v1063_v12 = vld [vmem:[#allocation2 + $0x58] sm:$0xff]   ;;  %v1067_v16 = vld [vmem:[#allocation2 + $0x60] sm:$0xff]  }
  0x17   :  { %953 = vmatprep.subr.bf16.mxu1 %v1056_v5  ;;  %v1064_v13 = vld [vmem:[#allocation2 + $0xd8] sm:$0xff]   ;;  %v1068_v17 = vld [vmem:[#allocation2 + $0xe0] sm:$0xff]   ;;  %v1071_v20 = vld [vmem:[#allocation2 + $0x68] sm:$0xff]  }
  0x18   :  { %v1065_v14 = vld [vmem:[#allocation2 + $0x18] sm:$0xff]   ;;  %v1069_v18 = vld [vmem:[#allocation2 + $0x20] sm:$0xff]   ;;  %v1072_v21 = vld [vmem:[#allocation2 + $0xe8] sm:$0xff]  }
  0x19   :  { %932 = vmatpush3.bf16.msra.mxu0 %v1057_v6  ;;  %v1066_v15 = vld [vmem:[#allocation2 + $0x98] sm:$0xff]   ;;  %v1070_v19 = vld [vmem:[#allocation2 + $0xa0] sm:$0xff]   ;;  %v1073_v22 = vld [vmem:[#allocation2 + $0x28] sm:$0xff]  }
  0x1a   :  { %954 = vmatpush3.bf16.msra.mxu1 %v1058_v7  ;;  %933 = vmatprep.subr.bf16.mxu0 %v1059_v8  ;;  %v1074_v23 = vld [vmem:[#allocation2 + $0xa8] sm:$0xff]   ;;  %v1075_v24 = vld [vmem:[#allocation2 + $0x70] sm:$0xff]   ;;  %v1079_v28 = vld [vmem:[#allocation2 + $0x78] sm:$0xff]  }
  0x1b   :  { %955 = vmatprep.subr.bf16.mxu1 %v1060_v9  ;;  %v1076_v25 = vld [vmem:[#allocation2 + $0xf0] sm:$0xff]   ;;  %v1080_v29 = vld [vmem:[#allocation2 + $0xf8] sm:$0xff]   ;;  %v36_v32 = vld [vmem:[%s1255_s0 + $0x8] sm:$0xff] }
  0x1c   :  { %v1077_v26 = vld [vmem:[#allocation2 + $0x30] sm:$0xff]   ;;  %v1081_v30 = vld [vmem:[#allocation2 + $0x38] sm:$0xff]   ;;  %v35_v34 = vld [vmem:[%s1255_s0] sm:$0xff]  ;;  %v44_v35 = vpack.c.bf16 %v36_v32, %v36_v32 }
  0x1d   :  { %934 = vmatpush3.bf16.msra.mxu0 %v1061_v10  ;;  %v1078_v27 = vld [vmem:[#allocation2 + $0xb0] sm:$0xff]   ;;  %v1082_v31 = vld [vmem:[#allocation2 + $0xb8] sm:$0xff]   ;;  %v43_v37 = vpack.c.bf16 %v35_v34, %v35_v34  ;;  %v1083_v40 = vld [vmem:[#allocation2 + $0x140] sm:$0xff]  }
  0x1e   :  { %956 = vmatpush3.bf16.msra.mxu1 %v1062_v11  ;;  %935 = vmatprep.subr.bf16.mxu0 %v1063_v12  ;;  %v38_v33 = vld [vmem:[%s1255_s0 + $0x18] sm:$0xff]  ;;  %v37_v38 = vld [vmem:[%s1255_s0 + $0x10] sm:$0xff]  ;;  %v1084_v41 = vld [vmem:[#allocation2 + $0x1c0] sm:$0xff]  }
  0x1f   :  { %957 = vmatprep.subr.bf16.mxu1 %v1064_v13  ;;  %v46_v36 = vpack.c.bf16 %v38_v33, %v38_v33  ;;  %v45_v39 = vpack.c.bf16 %v37_v38, %v37_v38  ;;  %602 = vmatprep.mubr.bf16.mxu0 %v44_v35  ;;  %v1085_v42 = vld [vmem:[#allocation2 + $0x100] sm:$0xff]   ;;  %v1087_v44 = vld [vmem:[#allocation2 + $0x148] sm:$0xff]   ;;  %v1091_v48 = vld [vmem:[#allocation2 + $0x150] sm:$0xff]  }
  0x20   :  { %v1086_v43 = vld [vmem:[#allocation2 + $0x180] sm:$0xff]   ;;  %v1088_v45 = vld [vmem:[#allocation2 + $0x1c8] sm:$0xff]   ;;  %v1092_v49 = vld [vmem:[#allocation2 + $0x1d0] sm:$0xff]  }
  0x21   :  { %936 = vmatpush3.bf16.msra.mxu0 %v1065_v14  ;;  %642 = vmatprep.mubr.bf16.mxu1 %v46_v36  ;;  %v1089_v46 = vld [vmem:[#allocation2 + $0x108] sm:$0xff]   ;;  %v1093_v50 = vld [vmem:[#allocation2 + $0x110] sm:$0xff]   ;;  %v1095_v52 = vld [vmem:[#allocation2 + $0x158] sm:$0xff]  }
  0x22   :  { %958 = vmatpush3.bf16.msra.mxu1 %v1066_v15  ;;  %937 = vmatprep.subr.bf16.mxu0 %v1067_v16  ;;  %v1090_v47 = vld [vmem:[#allocation2 + $0x188] sm:$0xff]   ;;  %v1094_v51 = vld [vmem:[#allocation2 + $0x190] sm:$0xff]   ;;  %v1096_v53 = vld [vmem:[#allocation2 + $0x1d8] sm:$0xff]  }
  0x23   :  { %959 = vmatprep.subr.bf16.mxu1 %v1068_v17  ;;  %v1097_v54 = vld [vmem:[#allocation2 + $0x118] sm:$0xff]   ;;  %v1099_v56 = vld [vmem:[#allocation2 + $0x160] sm:$0xff]   ;;  %v1103_v60 = vld [vmem:[#allocation2 + $0x168] sm:$0xff]   ;;  %v1154_v17 = vmov 0.0  }
  0x24   :  { %v1098_v55 = vld [vmem:[#allocation2 + $0x198] sm:$0xff]   ;;  %v1100_v57 = vld [vmem:[#allocation2 + $0x1e0] sm:$0xff]   ;;  %v1104_v61 = vld [vmem:[#allocation2 + $0x1e8] sm:$0xff]  }
  0x25   :  { %938 = vmatpush3.bf16.msra.mxu0 %v1069_v18  ;;  %v1101_v58 = vld [vmem:[#allocation2 + $0x120] sm:$0xff]   ;;  %v1105_v62 = vld [vmem:[#allocation2 + $0x128] sm:$0xff]   ;;  %v1107_v0 = vld [vmem:[#allocation2 + $0x170] sm:$0xff]  }
  0x26   :  { %960 = vmatpush3.bf16.msra.mxu1 %v1070_v19  ;;  %939 = vmatprep.subr.bf16.mxu0 %v1071_v20  ;;  %v1102_v59 = vld [vmem:[#allocation2 + $0x1a0] sm:$0xff]   ;;  %v1106_v63 = vld [vmem:[#allocation2 + $0x1a8] sm:$0xff]   ;;  %v1108_v1 = vld [vmem:[#allocation2 + $0x1f0] sm:$0xff]  }
  0x27   :  { %961 = vmatprep.subr.bf16.mxu1 %v1072_v21  ;;  %v1109_v2 = vld [vmem:[#allocation2 + $0x130] sm:$0xff]   ;;  %v1111_v4 = vld [vmem:[#allocation2 + $0x178] sm:$0xff]   ;;  %v40_v8 = vld [vmem:[%s1255_s0 + $0x28] sm:$0xff] }
  0x28   :  { %v1110_v3 = vld [vmem:[#allocation2 + $0x1b0] sm:$0xff]   ;;  %v1112_v5 = vld [vmem:[#allocation2 + $0x1f8] sm:$0xff]   ;;  %v48_v10 = vpack.c.bf16 %v40_v8, %v40_v8  ;;  %v39_v12 = vld [vmem:[%s1255_s0 + $0x20] sm:$0xff] }
  0x29   :  { %940 = vmatpush3.bf16.msra.mxu0 %v1073_v22  ;;  %v1113_v6 = vld [vmem:[#allocation2 + $0x138] sm:$0xff]   ;;  %v41_v13 = vld [vmem:[%s1255_s0 + $0x30] sm:$0xff]  ;;  %v47_v14 = vpack.c.bf16 %v39_v12, %v39_v12  ;;  %v1115_v16 = vld [vmem:[%s1258_s3] sm:$0xff]  }
  0x2a   :  { %962 = vmatpush3.bf16.msra.mxu1 %v1074_v23  ;;  %941 = vmatprep.subr.bf16.mxu0 %v1075_v24  ;;  %v1114_v7 = vld [vmem:[#allocation2 + $0x1b8] sm:$0xff]   ;;  %v49_v15 = vpack.c.bf16 %v41_v13, %v41_v13  ;;  %v1116_v18 = vld [vmem:[%s1258_s3 + $0x8] sm:$0xff]   ;;  %v1117_v19 = vld [vmem:[%s1258_s3 + $0x10] sm:$0xff]  }
  0x2b   :  { %963 = vmatprep.subr.bf16.mxu1 %v1076_v25  ;;  %v42_v9 = vld [vmem:[%s1255_s0 + $0x38] sm:$0xff]  ;;  %v1119_v21 = vld [vmem:[%s1258_s3 + $0x20] sm:$0xff]   ;;  %v1120_v22 = vld [vmem:[%s1258_s3 + $0x28] sm:$0xff]  }
  0x2c   :  { %v50_v11 = vpack.c.bf16 %v42_v9, %v42_v9  ;;  %v1118_v20 = vld [vmem:[%s1258_s3 + $0x18] sm:$0xff]   ;;  %v1121_v23 = vld [vmem:[%s1258_s3 + $0x30] sm:$0xff]  }
  0x2d   :  { %942 = vmatpush3.bf16.msra.mxu0 %v1077_v26  ;;  %v1122_v24 = vld [vmem:[%s1258_s3 + $0x38] sm:$0xff]  }
  0x2e   :  { %964 = vmatpush3.bf16.msra.mxu1 %v1078_v27  ;;  %943 = vmatprep.subr.bf16.mxu0 %v1079_v28  ;;  %v854_v27 = vld [vmem:[%s1257_s2] ss:$0 sm:$0xff] }
  0x2f   :  { %965 = vmatprep.subr.bf16.mxu1 %v1080_v29 }
  0x31   :  { %944 = vmatpush3.bf16.msra.mxu0 %v1081_v30 }
  0x32   :  { %966 = vmatpush3.bf16.msra.mxu1 %v1082_v31  ;;  %973 = vmatprep.subr.bf16.mxu0 %v1083_v40 }
  0x33   :  { %995 = vmatprep.subr.bf16.mxu1 %v1084_v41 }
  0x34   :  { %603 = vmatmul.mubr.bf16.vlgmr.msra.gmra.mrb[0].mxu0 %v43_v37 }
  0x35   :  { %643 = vmatmul.mubr.bf16.vlgmr.msra.gmra.mrb[0].mxu1 %v45_v39  ;;  %974 = vmatpush3.bf16.msra.mxu0 %v1085_v42 }
  0x36   :  { %996 = vmatpush3.bf16.msra.mxu1 %v1086_v43  ;;  %975 = vmatprep.subr.bf16.mxu0 %v1087_v44 }
  0x37   :  { %997 = vmatprep.subr.bf16.mxu1 %v1088_v45  ;;  %682 = vmatprep.mubr.bf16.mxu0 %v48_v10 }
  0x38   :  { %722 = vmatprep.mubr.bf16.mxu1 %v50_v11 }
  0x39   :  { %976 = vmatpush3.bf16.msra.mxu0 %v1089_v46 }
  0x3a   :  { %998 = vmatpush3.bf16.msra.mxu1 %v1090_v47  ;;  %977 = vmatprep.subr.bf16.mxu0 %v1091_v48 }
  0x3b   :  { %999 = vmatprep.subr.bf16.mxu1 %v1092_v49 }
  0x3d   :  { %978 = vmatpush3.bf16.msra.mxu0 %v1093_v50 }
  0x3e   :  { %1000 = vmatpush3.bf16.msra.mxu1 %v1094_v51  ;;  %979 = vmatprep.subr.bf16.mxu0 %v1095_v52 }
  0x3f   :  { %1001 = vmatprep.subr.bf16.mxu1 %v1096_v53 }
  0x41   :  { %980 = vmatpush3.bf16.msra.mxu0 %v1097_v54 }
  0x42   :  { %1002 = vmatpush3.bf16.msra.mxu1 %v1098_v55  ;;  %981 = vmatprep.subr.bf16.mxu0 %v1099_v56  ;;  %v920_v55 = vld [vmem:[%s1259_s4] ss:$0 sm:$0xff] }
  0x43   :  { %1003 = vmatprep.subr.bf16.mxu1 %v1100_v57 }
  0x45   :  { %982 = vmatpush3.bf16.msra.mxu0 %v1101_v58 }
  0x46   :  { %1004 = vmatpush3.bf16.msra.mxu1 %v1102_v59  ;;  %983 = vmatprep.subr.bf16.mxu0 %v1103_v60 }
  0x47   :  { %1005 = vmatprep.subr.bf16.mxu1 %v1104_v61 }
  0x49   :  { %984 = vmatpush3.bf16.msra.mxu0 %v1105_v62 }
  0x4a   :  { %1006 = vmatpush3.bf16.msra.mxu1 %v1106_v63  ;;  %985 = vmatprep.subr.bf16.mxu0 %v1107_v0 }
  0x4b   :  { %1007 = vmatprep.subr.bf16.mxu1 %v1108_v1 }
  0x4d   :  { %986 = vmatpush3.bf16.msra.mxu0 %v1109_v2 }
  0x4e   :  { %1008 = vmatpush3.bf16.msra.mxu1 %v1110_v3  ;;  %987 = vmatprep.subr.bf16.mxu0 %v1111_v4 }
  0x4f   :  { %1009 = vmatprep.subr.bf16.mxu1 %v1112_v5 }
  0x51   :  { %988 = vmatpush3.bf16.msra.mxu0 %v1113_v6 }
  0x52   :  { %1010 = vmatpush3.bf16.msra.mxu1 %v1114_v7  ;;  %1026 = vmatprep.subr.bf16.mxu0 %v1154_v17 }
  0x54   :  { %683 = vmatmul.mubr.bf16.vlgmr.msra.gmra.mrb[4].mxu0 %v47_v14 }
  0x55   :  { %723 = vmatmul.mubr.bf16.vlgmr.msra.gmra.mrb[4].mxu1 %v49_v15  ;;  %1027 = vmatpush3.bf16.msra.mxu0 %v1115_v16 }
  0x56   :  { %1028 = vmatprep.subr.bf16.mxu0 %v1154_v17  ;;  %1042 = vmatprep.mubr.msk.bf16.mxu0 %vm1155_vm0, %v1154_v17 }
  0x59   :  { %1029 = vmatpush3.bf16.msra.mxu0 %v1116_v18 }
  0x5a   :  { %1030 = vmatprep.subr.bf16.mxu0 %v1154_v17 }
  0x5d   :  { %1031 = vmatpush3.bf16.msra.mxu0 %v1117_v19 }
  0x5e   :  { %1032 = vmatprep.subr.bf16.mxu0 %v1154_v17 }
  0x61   :  { %1033 = vmatpush3.bf16.msra.mxu0 %v1118_v20 }
  0x62   :  { %1034 = vmatprep.subr.bf16.mxu0 %v1154_v17 }
  0x65   :  { %1035 = vmatpush3.bf16.msra.mxu0 %v1119_v21 }
  0x66   :  { %1036 = vmatprep.subr.bf16.mxu0 %v1154_v17 }
  0x69   :  { %1037 = vmatpush3.bf16.msra.mxu0 %v1120_v22 }
  0x6a   :  { %1038 = vmatprep.subr.bf16.mxu0 %v1154_v17 }
  0x6d   :  { %1039 = vmatpush3.bf16.msra.mxu0 %v1121_v23 }
  0x6e   :  { %1040 = vmatprep.subr.bf16.mxu0 %v1154_v17 }
  0x71   :  { %1041 = vmatpush3.bf16.msra.mxu0 %v1122_v24 }
 0x107   :  { %v945_v25 = vpop.f32.mrb[0].mxu0 }
 0x108   :  { %v967_v26 = vpop.f32.mrb[0].mxu1  ;;  %v946_v28 = vpop.f32.mrb[1].mxu0 }
 0x109   :  { %v968_v29 = vpop.f32.mrb[1].mxu1  ;;  %v947_v30 = vadd.f32 %v946_v28, %v945_v25  ;;  %v948_v32 = vpop.f32.mrb[2].mxu0 }
 0x10a   :  { %v969_v31 = vadd.f32 %v968_v29, %v967_v26  ;;  %v970_v33 = vpop.f32.mrb[2].mxu1  ;;  %v949_v34 = vpop.f32.mrb[3].mxu0 }
 0x10b   :  { %v971_v35 = vpop.f32.mrb[3].mxu1  ;;  %v605_v36 = vadd.f32 %v947_v30, %v854_v27 }
 0x10d   :  { %v645_v37 = vadd.f32 %v969_v31, %v605_v36 }
 0x127   :  { %v989_v38 = vpop.f32.mrb[4].mxu0 }
 0x128   :  { %v1011_v39 = vpop.f32.mrb[4].mxu1  ;;  %v990_v40 = vpop.f32.mrb[5].mxu0 }
 0x129   :  { %v991_v41 = vadd.f32 %v990_v40, %v989_v38  ;;  %v1012_v42 = vpop.f32.mrb[5].mxu1  ;;  %v992_v43 = vpop.f32.mrb[6].mxu0 }
 0x12a   :  { %v1013_v44 = vadd.f32 %v1012_v42, %v1011_v39  ;;  %v1014_v45 = vpop.f32.mrb[6].mxu1  ;;  %v993_v46 = vpop.f32.mrb[7].mxu0 }
 0x12b   :  { %v685_v47 = vadd.f32 %v991_v41, %v645_v37  ;;  %v1015_v48 = vpop.f32.mrb[7].mxu1 }
 0x12d   :  { %v725_v49 = vadd.f32 %v1013_v44, %v685_v47 }
 0x12f   :  { %v919_v50 = vmul.f32 -1.442695, %v725_v49 }
 0x131   :  { %1123 = vpow2.f32 %v919_v50 }
 0x13b   :  { %v1124_v51 = vpop.eup %1123 }
 0x13c   :  { %v733_v52 = vadd.f32 1.0, %v1124_v51 }
 0x13e   :  { %1125 = vrcp.f32 %v733_v52 }
 0x148   :  { %v1126_v53 = vpop.eup %1125 }
 0x149   :  { %v736_v54 = vpack.c.bf16 %v1126_v53, %v1126_v53 }
 0x14b   :  { %1043 = vmatmul.mubr.bf16.vlgmr.msra.gmra.mrb[8].mxu0 %v736_v54 }
 0x21e   :  { %v842_v56 = vpop.f32.mrb[8].mxu0 }
 0x21f   :  { %v843_v57 = vadd.f32 %v920_v55, %v842_v56  ;;  %v1044_v58 = vpop.f32.mrb[9].mxu0 }
 0x220   :  { %v845_v59 = vpop.f32.mrb[10].mxu0 }
 0x221   :  { %848 = vst [vmem:[%s1260_s5] sm:$0xff] %v843_v57  ;;  %v1045_v60 = vpop.f32.mrb[11].mxu0 }
 0x222   :  { %853 = vsyncpa [#allocation3], 1 }

</bundles_post_ra>
